<compile_context>
chip_gen: v7x
topology: tpu7x:2x2x1
jax: 0.10.0
libtpu: 0.0.40
codegen_flags: <defaults>
</compile_context>

<pallas_src>
import math

import jax
import jax.numpy as jnp
from jax import lax
from jax.experimental import pallas as pl
from jax.experimental.pallas import tpu as pltpu


def _pick_tile_h(H, W, Cin, Cout2, itemsize=4, vmem_stage_budget=4 << 20):
    """Rows per grid step: largest slab within the per-stage VMEM budget whose
    flat spatial size (tile_h * W) stays a multiple of 128 lanes so output
    stores are lane-dense."""
    row_bytes = (Cin + 2 * Cout2) * W * itemsize
    th = max(1, vmem_stage_budget // max(row_bytes, 1))
    if th >= H:
        return H
    g = 128 // math.gcd(W, 128)          # smallest granule with (g*W) % 128 == 0
    th = max(g, (th // g) * g)
    return min(th, H)


def dwblock_forward(x, w1, b1, w2, b2, *, negative_slope=1.0, res_scale=1.0,
                    tile_h=None, compute_dtype=None):
    """Pallas implementation of DWBlock.forward (NCHW in / NCHW out).

    x : (N, Cin, H, W)
    w1: (Cout, Cin, K, K)   first conv weight (padding = K//2, stride 1)
    b1: (Cout,)
    w2: (Cout2, Cout, 1, 1) or (Cout2, Cout)   1x1 conv weight
    b2: (Cout2,)
    """
    N, Cin, H, W = x.shape
    Cout, Cin_w, K, K2 = w1.shape
    assert K == K2 and Cin_w == Cin
    w2_2d = w2.reshape(w2.shape[0], -1)
    Cout2, Cmid = w2_2d.shape
    assert Cmid == Cout, "1x1 conv input channels must equal first conv output channels"

    p = K // 2
    cdt = jnp.dtype(compute_dtype) if compute_dtype is not None else jnp.dtype(x.dtype)
    out_dtype = x.dtype
    neg = float(negative_slope)
    scale = float(res_scale)

    TH = int(tile_h) if tile_h is not None else _pick_tile_h(H, W, Cin, Cout2)
    R = -(-H // TH)                  # row blocks per image
    Hr = R * TH                      # H rounded up to a multiple of TH
    THp = TH + 2 * p                 # rows per input slab (with halo)
    L_in = THp * W                   # flat spatial length of an input slab
    L_out = TH * W                   # flat spatial length of an output slab

    # ---- layout plumbing (NCHW kept; only H is zero-padded) ------------------
    xp = jnp.pad(x, ((0, 0), (0, 0), (p, Hr - H + p), (0, 0)))   # (N,Cin,Hr+2p,W)
    if R == 1:
        xb = xp[:, None]                                          # (N,1,Cin,THp,W)
    else:
        # Halo rows are duplicated per block (2p/TH extra read bytes); an
        # Element-indexed (overlapping) BlockSpec could avoid the duplication.
        xb = jnp.stack([lax.slice_in_dim(xp, r * TH, r * TH + THp, axis=2)
                        for r in range(R)], axis=1)               # (N,R,Cin,THp,W)
    xb = xb.reshape(N, R, Cin, L_in).astype(cdt)

    # Per-tap (Cout, Cin) weight matrices, tap t = dy*K + dx.
    w1m = jnp.transpose(w1, (2, 3, 0, 1)).reshape(K * K, Cout, Cin).astype(cdt)
    w2m = w2_2d.astype(cdt)                                       # (Cout2, Cout)
    b1c = b1.reshape(Cout, 1).astype(jnp.float32)
    b2c = b2.reshape(Cout2, 1).astype(jnp.float32)

    # ---- fused kernel: one (batch, row-block) slab per grid step -------------
    def kernel(x_ref, w1_ref, b1_ref, w2_ref, b2_ref, o_ref):
        xt = x_ref[0, 0]                                          # (Cin, L_in)
        col = lax.broadcasted_iota(jnp.int32, (1, L_in), 1) % W   # output column
        acc0 = jnp.zeros((Cout, L_in), jnp.float32)
        acc1 = jnp.zeros((Cout, L_in), jnp.float32)
        for dy in range(K):
            for dx in range(K):
                t = dy * K + dx
                s = dy * W + (dx - p)       # flat source offset for this tap
                src = xt if s == 0 else pltpu.roll(xt, (-s) % L_in, 1)
                if dx != p:
                    # zero contributions that would cross the left/right edge
                    m = (col >= (p - dx)) & (col < (W + p - dx))
                    src = jnp.where(m, src, jnp.zeros_like(src))
                contrib = jnp.dot(w1_ref[t], src,
                                  preferred_element_type=jnp.float32)
                if t % 2 == 0:
                    acc0 = acc0 + contrib
                else:
                    acc1 = acc1 + contrib
        a1 = acc0 + acc1 + b1_ref[...]                            # (Cout, L_in)
        a1 = jnp.where(a1 >= 0, a1, neg * a1)                     # LeakyReLU
        y = jnp.dot(w2_ref[...], a1.astype(cdt),
                    preferred_element_type=jnp.float32) + b2_ref[...]
        y = jnp.where(y >= 0, y, neg * y)                         # LeakyReLU
        y = y * scale
        o_ref[0] = y[:, :L_out].astype(o_ref.dtype)               # drop halo rows

    # ---- VMEM / cost bookkeeping from the actual block sizes -----------------
    csz = jnp.dtype(cdt).itemsize
    osz = jnp.dtype(out_dtype).itemsize
    in_blk = Cin * L_in * csz
    out_blk = Cout2 * L_out * osz
    wgt = (K * K * Cout * Cin + Cout2 * Cout) * csz + (Cout + Cout2) * 4
    interm = (3 * Cout + Cout2 + 2 * Cin) * L_in * 4
    vmem_limit = int(min(max(2 * (2 * (in_blk + out_blk) + 2 * wgt + interm),
                             16 << 20), 64 << 20))
    flops = 2 * N * H * W * (K * K * Cin * Cout + Cout * Cout2)
    bytes_accessed = int(N * R * (in_blk + out_blk) + 2 * wgt)

    out_flat = pl.pallas_call(
        kernel,
        out_shape=jax.ShapeDtypeStruct((N, Cout2, Hr * W), out_dtype),
        grid_spec=pltpu.PrefetchScalarGridSpec(
            num_scalar_prefetch=0,
            grid=(N, R),
            in_specs=[
                pl.BlockSpec((1, 1, Cin, L_in), lambda n, r: (n, r, 0, 0)),
                pl.BlockSpec((K * K, Cout, Cin), lambda n, r: (0, 0, 0)),
                pl.BlockSpec((Cout, 1), lambda n, r: (0, 0)),
                pl.BlockSpec((Cout2, Cout), lambda n, r: (0, 0)),
                pl.BlockSpec((Cout2, 1), lambda n, r: (0, 0)),
            ],
            out_specs=pl.BlockSpec((1, Cout2, L_out), lambda n, r: (n, 0, r)),
        ),
        compiler_params=pltpu.CompilerParams(
            dimension_semantics=("parallel", "parallel"),
            vmem_limit_bytes=vmem_limit,
        ),
        cost_estimate=pl.CostEstimate(
            flops=flops, transcendentals=0, bytes_accessed=bytes_accessed),
    )(xb, w1m, b1c, w2m, b2c)

    out = out_flat.reshape(N, Cout2, Hr, W)                       # free reshape
    if Hr != H:
        out = out[:, :, :H, :]
    return out


def _dwblock_reference(x, w1, b1, w2, b2, negative_slope, res_scale):
    """Pure-JAX reference mirroring the PyTorch DWBlock forward."""
    p = w1.shape[-1] // 2
    y = lax.conv_general_dilated(
        x, w1, window_strides=(1, 1), padding=((p, p), (p, p)),
        dimension_numbers=("NCHW", "OIHW", "NCHW"))
    y = y + b1[None, :, None, None]
    y = jnp.where(y >= 0, y, negative_slope * y)
    w2_4d = w2.reshape(w2.shape[0], w2.shape[1], 1, 1)
    y = lax.conv_general_dilated(
        y, w2_4d, window_strides=(1, 1), padding="VALID",
        dimension_numbers=("NCHW", "OIHW", "NCHW"))
    y = y + b2[None, :, None, None]
    y = jnp.where(y >= 0, y, negative_slope * y)
    return y * res_scale


if __name__ == "__main__":
    key = jax.random.PRNGKey(0)
    k1, k2, k3, k4, k5 = jax.random.split(key, 5)

    N, C, H, W, K = 2, 4, 16, 16, 3
    x = jax.random.normal(k1, (N, C, H, W), dtype=jnp.float32)
    w1 = jax.random.normal(k2, (C, C, K, K), dtype=jnp.float32) * 0.1
    b1 = jax.random.normal(k3, (C,), dtype=jnp.float32) * 0.1
    w2 = jax.random.normal(k4, (C, C, 1, 1), dtype=jnp.float32) * 0.1
    b2 = jax.random.normal(k5, (C,), dtype=jnp.float32) * 0.1

    # Module-faithful config: act = nn.LeakyReLU(True) -> negative_slope == 1.0.
    y_faithful = jax.block_until_ready(dwblock_forward(x, w1, b1, w2, b2))
    ref_faithful = _dwblock_reference(x, w1, b1, w2, b2, 1.0, 1.0)
    assert y_faithful.shape == ref_faithful.shape == (N, C, H, W)
    err0 = float(jnp.max(jnp.abs(y_faithful - ref_faithful)))
    assert bool(jnp.allclose(y_faithful, ref_faithful, atol=1e-4, rtol=1e-4)), err0

    # Conventional slope exercises the LeakyReLU negative branch as well.
    y_lrelu = jax.block_until_ready(
        dwblock_forward(x, w1, b1, w2, b2, negative_slope=0.01, res_scale=1.0))
    ref_lrelu = _dwblock_reference(x, w1, b1, w2, b2, 0.01, 1.0)
    err1 = float(jnp.max(jnp.abs(y_lrelu - ref_lrelu)))
    assert bool(jnp.allclose(y_lrelu, ref_lrelu, atol=1e-4, rtol=1e-4)), err1

    print("KERNEL_OK")
</pallas_src>

<mosaic_0001>
module attributes {stable_mosaic.version = 11 : i64} {
  func.func @kernel(%arg0: i32, %arg1: i32, %arg2: memref<1x1x4x288xf32, #tpu.memory_space<vmem>>, %arg3: memref<9x4x4xf32, #tpu.memory_space<vmem>>, %arg4: memref<4x1xf32, #tpu.memory_space<vmem>>, %arg5: memref<4x4xf32, #tpu.memory_space<vmem>>, %arg6: memref<4x1xf32, #tpu.memory_space<vmem>>, %arg7: memref<1x4x256xf32, #tpu.memory_space<vmem>>) attributes {dimension_semantics = [#tpu.dimension_semantics<parallel>, #tpu.dimension_semantics<parallel>], iteration_bounds = array<i64: 2, 1>, scalar_prefetch = 0 : i64, scratch_operands = 0 : i64, tpu.core_type = #tpu.core_type<tc>, window_params = [{transform_indices = @transform_0, window_bounds = array<i64: 1, 1, 4, 288>}, {pipeline_mode = #tpu.pipeline_mode<synchronous>, transform_indices = @transform_1, window_bounds = array<i64: 9, 4, 4>}, {pipeline_mode = #tpu.pipeline_mode<synchronous>, transform_indices = @transform_2, window_bounds = array<i64: 4, 1>}, {pipeline_mode = #tpu.pipeline_mode<synchronous>, transform_indices = @transform_3, window_bounds = array<i64: 4, 4>}, {pipeline_mode = #tpu.pipeline_mode<synchronous>, transform_indices = @transform_4, window_bounds = array<i64: 4, 1>}, {transform_indices = @transform_5, window_bounds = array<i64: 1, 4, 256>}]} {
    %c0 = arith.constant 0 : index
    %c0_0 = arith.constant 0 : index
    %c0_1 = arith.constant 0 : index
    %c0_2 = arith.constant 0 : index
    %0 = vector.load %arg2[%c0, %c0_0, %c0_1, %c0_2] : memref<1x1x4x288xf32, #tpu.memory_space<vmem>>, vector<1x1x4x288xf32>
    %1 = vector.shape_cast %0 : vector<1x1x4x288xf32> to vector<4x288xf32>
    %2 = tpu.iota {dimensions = array<i32: 1>} : vector<1x288xi32>
    %c16_i32 = arith.constant 16 : i32
    %c0_i32 = arith.constant 0 : i32
    %3 = arith.cmpi eq, %c16_i32, %c0_i32 : i32
    %c1_i32 = arith.constant 1 : i32
    %4 = arith.select %3, %c1_i32, %c16_i32 : i32
    %5 = vector.broadcast %4 : i32 to vector<1x288xi32>
    %6 = arith.remsi %2, %5 : vector<1x288xi32>
    %c0_i32_3 = arith.constant 0 : i32
    %7 = vector.broadcast %c0_i32_3 : i32 to vector<1x288xi32>
    %8 = arith.cmpi ne, %6, %7 : vector<1x288xi32>
    %c0_i32_4 = arith.constant 0 : i32
    %9 = vector.broadcast %c0_i32_4 : i32 to vector<1x288xi32>
    %10 = arith.cmpi slt, %6, %9 : vector<1x288xi32>
    %c0_i32_5 = arith.constant 0 : i32
    %11 = arith.cmpi slt, %4, %c0_i32_5 : i32
    %12 = vector.broadcast %11 : i1 to vector<1x288xi1>
    %13 = vector.broadcast %12 : vector<1x288xi1> to vector<1x288xi1>
    %14 = arith.xori %10, %13 : vector<1x288xi1>
    %15 = arith.andi %14, %8 : vector<1x288xi1>
    %16 = vector.broadcast %4 : i32 to vector<1x288xi32>
    %17 = arith.addi %6, %16 : vector<1x288xi32>
    %18 = arith.select %15, %17, %6 : vector<1x288xi1>, vector<1x288xi32>
    %cst = arith.constant 0.000000e+00 : f32
    %19 = vector.broadcast %cst : f32 to vector<4x288xf32>
    %cst_6 = arith.constant 0.000000e+00 : f32
    %20 = vector.broadcast %cst_6 : f32 to vector<4x288xf32>
    %c1_i32_7 = arith.constant 1 : i32
    %21 = tpu.dynamic_rotate %1 by %c1_i32_7 dim 1 : vector<4x288xf32>, i32 -> vector<4x288xf32>
    %c1_i32_8 = arith.constant 1 : i32
    %22 = vector.broadcast %c1_i32_8 : i32 to vector<1x288xi32>
    %23 = arith.cmpi sge, %18, %22 : vector<1x288xi32>
    %c17_i32 = arith.constant 17 : i32
    %24 = vector.broadcast %c17_i32 : i32 to vector<1x288xi32>
    %25 = arith.cmpi slt, %18, %24 : vector<1x288xi32>
    %26 = arith.andi %23, %25 : vector<1x288xi1>
    %cst_9 = arith.constant 0.000000e+00 : f32
    %27 = vector.broadcast %cst_9 : f32 to vector<4x288xf32>
    %28 = vector.shape_cast %26 : vector<1x288xi1> to vector<1x288xi1>
    %29 = vector.broadcast %28 : vector<1x288xi1> to vector<4x288xi1>
    %30 = arith.select %29, %21, %27 : vector<4x288xi1>, vector<4x288xf32>
    %c0_10 = arith.constant 0 : index
    %c0_11 = arith.constant 0 : index
    %c0_12 = arith.constant 0 : index
    %31 = vector.load %arg3[%c0_10, %c0_11, %c0_12] : memref<9x4x4xf32, #tpu.memory_space<vmem>>, vector<1x4x4xf32>
    %32 = vector.shape_cast %31 : vector<1x4x4xf32> to vector<4x4xf32>
    %cst_13 = arith.constant dense<0.000000e+00> : vector<4x288xf32>
    %33 = tpu.matmul %32, %30, %cst_13 {dimension_numbers = #tpu.dot_dimension_numbers<[1], [0], [0], [1], [0, 0, 1, 1], [], []>} : vector<4x4xf32>, vector<4x288xf32>, vector<4x288xf32> -> vector<4x288xf32>
    %34 = arith.addf %19, %33 : vector<4x288xf32>
    %c1 = arith.constant 1 : index
    %c0_14 = arith.constant 0 : index
    %c0_15 = arith.constant 0 : index
    %35 = vector.load %arg3[%c1, %c0_14, %c0_15] : memref<9x4x4xf32, #tpu.memory_space<vmem>>, vector<1x4x4xf32>
    %36 = vector.shape_cast %35 : vector<1x4x4xf32> to vector<4x4xf32>
    %cst_16 = arith.constant dense<0.000000e+00> : vector<4x288xf32>
    %37 = tpu.matmul %36, %1, %cst_16 {dimension_numbers = #tpu.dot_dimension_numbers<[1], [0], [0], [1], [0, 0, 1, 1], [], []>} : vector<4x4xf32>, vector<4x288xf32>, vector<4x288xf32> -> vector<4x288xf32>
    %38 = arith.addf %20, %37 : vector<4x288xf32>
    %c287_i32 = arith.constant 287 : i32
    %39 = tpu.dynamic_rotate %1 by %c287_i32 dim 1 : vector<4x288xf32>, i32 -> vector<4x288xf32>
    %c-1_i32 = arith.constant -1 : i32
    %40 = vector.broadcast %c-1_i32 : i32 to vector<1x288xi32>
    %41 = arith.cmpi sge, %18, %40 : vector<1x288xi32>
    %c15_i32 = arith.constant 15 : i32
    %42 = vector.broadcast %c15_i32 : i32 to vector<1x288xi32>
    %43 = arith.cmpi slt, %18, %42 : vector<1x288xi32>
    %44 = arith.andi %41, %43 : vector<1x288xi1>
    %cst_17 = arith.constant 0.000000e+00 : f32
    %45 = vector.broadcast %cst_17 : f32 to vector<4x288xf32>
    %46 = vector.shape_cast %44 : vector<1x288xi1> to vector<1x288xi1>
    %47 = vector.broadcast %46 : vector<1x288xi1> to vector<4x288xi1>
    %48 = arith.select %47, %39, %45 : vector<4x288xi1>, vector<4x288xf32>
    %c2 = arith.constant 2 : index
    %c0_18 = arith.constant 0 : index
    %c0_19 = arith.constant 0 : index
    %49 = vector.load %arg3[%c2, %c0_18, %c0_19] : memref<9x4x4xf32, #tpu.memory_space<vmem>>, vector<1x4x4xf32>
    %50 = vector.shape_cast %49 : vector<1x4x4xf32> to vector<4x4xf32>
    %cst_20 = arith.constant dense<0.000000e+00> : vector<4x288xf32>
    %51 = tpu.matmul %50, %48, %cst_20 {dimension_numbers = #tpu.dot_dimension_numbers<[1], [0], [0], [1], [0, 0, 1, 1], [], []>} : vector<4x4xf32>, vector<4x288xf32>, vector<4x288xf32> -> vector<4x288xf32>
    %52 = arith.addf %34, %51 : vector<4x288xf32>
    %c273_i32 = arith.constant 273 : i32
    %53 = tpu.dynamic_rotate %1 by %c273_i32 dim 1 : vector<4x288xf32>, i32 -> vector<4x288xf32>
    %c1_i32_21 = arith.constant 1 : i32
    %54 = vector.broadcast %c1_i32_21 : i32 to vector<1x288xi32>
    %55 = arith.cmpi sge, %18, %54 : vector<1x288xi32>
    %c17_i32_22 = arith.constant 17 : i32
    %56 = vector.broadcast %c17_i32_22 : i32 to vector<1x288xi32>
    %57 = arith.cmpi slt, %18, %56 : vector<1x288xi32>
    %58 = arith.andi %55, %57 : vector<1x288xi1>
    %cst_23 = arith.constant 0.000000e+00 : f32
    %59 = vector.broadcast %cst_23 : f32 to vector<4x288xf32>
    %60 = vector.shape_cast %58 : vector<1x288xi1> to vector<1x288xi1>
    %61 = vector.broadcast %60 : vector<1x288xi1> to vector<4x288xi1>
    %62 = arith.select %61, %53, %59 : vector<4x288xi1>, vector<4x288xf32>
    %c3 = arith.constant 3 : index
    %c0_24 = arith.constant 0 : index
    %c0_25 = arith.constant 0 : index
    %63 = vector.load %arg3[%c3, %c0_24, %c0_25] : memref<9x4x4xf32, #tpu.memory_space<vmem>>, vector<1x4x4xf32>
    %64 = vector.shape_cast %63 : vector<1x4x4xf32> to vector<4x4xf32>
    %cst_26 = arith.constant dense<0.000000e+00> : vector<4x288xf32>
    %65 = tpu.matmul %64, %62, %cst_26 {dimension_numbers = #tpu.dot_dimension_numbers<[1], [0], [0], [1], [0, 0, 1, 1], [], []>} : vector<4x4xf32>, vector<4x288xf32>, vector<4x288xf32> -> vector<4x288xf32>
    %66 = arith.addf %38, %65 : vector<4x288xf32>
    %c272_i32 = arith.constant 272 : i32
    %67 = tpu.dynamic_rotate %1 by %c272_i32 dim 1 : vector<4x288xf32>, i32 -> vector<4x288xf32>
    %c4 = arith.constant 4 : index
    %c0_27 = arith.constant 0 : index
    %c0_28 = arith.constant 0 : index
    %68 = vector.load %arg3[%c4, %c0_27, %c0_28] : memref<9x4x4xf32, #tpu.memory_space<vmem>>, vector<1x4x4xf32>
    %69 = vector.shape_cast %68 : vector<1x4x4xf32> to vector<4x4xf32>
    %cst_29 = arith.constant dense<0.000000e+00> : vector<4x288xf32>
    %70 = tpu.matmul %69, %67, %cst_29 {dimension_numbers = #tpu.dot_dimension_numbers<[1], [0], [0], [1], [0, 0, 1, 1], [], []>} : vector<4x4xf32>, vector<4x288xf32>, vector<4x288xf32> -> vector<4x288xf32>
    %71 = arith.addf %52, %70 : vector<4x288xf32>
    %c271_i32 = arith.constant 271 : i32
    %72 = tpu.dynamic_rotate %1 by %c271_i32 dim 1 : vector<4x288xf32>, i32 -> vector<4x288xf32>
    %c-1_i32_30 = arith.constant -1 : i32
    %73 = vector.broadcast %c-1_i32_30 : i32 to vector<1x288xi32>
    %74 = arith.cmpi sge, %18, %73 : vector<1x288xi32>
    %c15_i32_31 = arith.constant 15 : i32
    %75 = vector.broadcast %c15_i32_31 : i32 to vector<1x288xi32>
    %76 = arith.cmpi slt, %18, %75 : vector<1x288xi32>
    %77 = arith.andi %74, %76 : vector<1x288xi1>
    %cst_32 = arith.constant 0.000000e+00 : f32
    %78 = vector.broadcast %cst_32 : f32 to vector<4x288xf32>
    %79 = vector.shape_cast %77 : vector<1x288xi1> to vector<1x288xi1>
    %80 = vector.broadcast %79 : vector<1x288xi1> to vector<4x288xi1>
    %81 = arith.select %80, %72, %78 : vector<4x288xi1>, vector<4x288xf32>
    %c5 = arith.constant 5 : index
    %c0_33 = arith.constant 0 : index
    %c0_34 = arith.constant 0 : index
    %82 = vector.load %arg3[%c5, %c0_33, %c0_34] : memref<9x4x4xf32, #tpu.memory_space<vmem>>, vector<1x4x4xf32>
    %83 = vector.shape_cast %82 : vector<1x4x4xf32> to vector<4x4xf32>
    %cst_35 = arith.constant dense<0.000000e+00> : vector<4x288xf32>
    %84 = tpu.matmul %83, %81, %cst_35 {dimension_numbers = #tpu.dot_dimension_numbers<[1], [0], [0], [1], [0, 0, 1, 1], [], []>} : vector<4x4xf32>, vector<4x288xf32>, vector<4x288xf32> -> vector<4x288xf32>
    %85 = arith.addf %66, %84 : vector<4x288xf32>
    %c257_i32 = arith.constant 257 : i32
    %86 = tpu.dynamic_rotate %1 by %c257_i32 dim 1 : vector<4x288xf32>, i32 -> vector<4x288xf32>
    %c1_i32_36 = arith.constant 1 : i32
    %87 = vector.broadcast %c1_i32_36 : i32 to vector<1x288xi32>
    %88 = arith.cmpi sge, %18, %87 : vector<1x288xi32>
    %c17_i32_37 = arith.constant 17 : i32
    %89 = vector.broadcast %c17_i32_37 : i32 to vector<1x288xi32>
    %90 = arith.cmpi slt, %18, %89 : vector<1x288xi32>
    %91 = arith.andi %88, %90 : vector<1x288xi1>
    %cst_38 = arith.constant 0.000000e+00 : f32
    %92 = vector.broadcast %cst_38 : f32 to vector<4x288xf32>
    %93 = vector.shape_cast %91 : vector<1x288xi1> to vector<1x288xi1>
    %94 = vector.broadcast %93 : vector<1x288xi1> to vector<4x288xi1>
    %95 = arith.select %94, %86, %92 : vector<4x288xi1>, vector<4x288xf32>
    %c6 = arith.constant 6 : index
    %c0_39 = arith.constant 0 : index
    %c0_40 = arith.constant 0 : index
    %96 = vector.load %arg3[%c6, %c0_39, %c0_40] : memref<9x4x4xf32, #tpu.memory_space<vmem>>, vector<1x4x4xf32>
    %97 = vector.shape_cast %96 : vector<1x4x4xf32> to vector<4x4xf32>
    %cst_41 = arith.constant dense<0.000000e+00> : vector<4x288xf32>
    %98 = tpu.matmul %97, %95, %cst_41 {dimension_numbers = #tpu.dot_dimension_numbers<[1], [0], [0], [1], [0, 0, 1, 1], [], []>} : vector<4x4xf32>, vector<4x288xf32>, vector<4x288xf32> -> vector<4x288xf32>
    %99 = arith.addf %71, %98 : vector<4x288xf32>
    %c256_i32 = arith.constant 256 : i32
    %100 = tpu.dynamic_rotate %1 by %c256_i32 dim 1 : vector<4x288xf32>, i32 -> vector<4x288xf32>
    %c7 = arith.constant 7 : index
    %c0_42 = arith.constant 0 : index
    %c0_43 = arith.constant 0 : index
    %101 = vector.load %arg3[%c7, %c0_42, %c0_43] : memref<9x4x4xf32, #tpu.memory_space<vmem>>, vector<1x4x4xf32>
    %102 = vector.shape_cast %101 : vector<1x4x4xf32> to vector<4x4xf32>
    %cst_44 = arith.constant dense<0.000000e+00> : vector<4x288xf32>
    %103 = tpu.matmul %102, %100, %cst_44 {dimension_numbers = #tpu.dot_dimension_numbers<[1], [0], [0], [1], [0, 0, 1, 1], [], []>} : vector<4x4xf32>, vector<4x288xf32>, vector<4x288xf32> -> vector<4x288xf32>
    %104 = arith.addf %85, %103 : vector<4x288xf32>
    %c255_i32 = arith.constant 255 : i32
    %105 = tpu.dynamic_rotate %1 by %c255_i32 dim 1 : vector<4x288xf32>, i32 -> vector<4x288xf32>
    %c-1_i32_45 = arith.constant -1 : i32
    %106 = vector.broadcast %c-1_i32_45 : i32 to vector<1x288xi32>
    %107 = arith.cmpi sge, %18, %106 : vector<1x288xi32>
    %c15_i32_46 = arith.constant 15 : i32
    %108 = vector.broadcast %c15_i32_46 : i32 to vector<1x288xi32>
    %109 = arith.cmpi slt, %18, %108 : vector<1x288xi32>
    %110 = arith.andi %107, %109 : vector<1x288xi1>
    %cst_47 = arith.constant 0.000000e+00 : f32
    %111 = vector.broadcast %cst_47 : f32 to vector<4x288xf32>
    %112 = vector.shape_cast %110 : vector<1x288xi1> to vector<1x288xi1>
    %113 = vector.broadcast %112 : vector<1x288xi1> to vector<4x288xi1>
    %114 = arith.select %113, %105, %111 : vector<4x288xi1>, vector<4x288xf32>
    %c8 = arith.constant 8 : index
    %c0_48 = arith.constant 0 : index
    %c0_49 = arith.constant 0 : index
    %115 = vector.load %arg3[%c8, %c0_48, %c0_49] : memref<9x4x4xf32, #tpu.memory_space<vmem>>, vector<1x4x4xf32>
    %116 = vector.shape_cast %115 : vector<1x4x4xf32> to vector<4x4xf32>
    %cst_50 = arith.constant dense<0.000000e+00> : vector<4x288xf32>
    %117 = tpu.matmul %116, %114, %cst_50 {dimension_numbers = #tpu.dot_dimension_numbers<[1], [0], [0], [1], [0, 0, 1, 1], [], []>} : vector<4x4xf32>, vector<4x288xf32>, vector<4x288xf32> -> vector<4x288xf32>
    %118 = arith.addf %99, %117 : vector<4x288xf32>
    %119 = arith.addf %118, %104 : vector<4x288xf32>
    %c0_51 = arith.constant 0 : index
    %c0_52 = arith.constant 0 : index
    %120 = vector.load %arg4[%c0_51, %c0_52] : memref<4x1xf32, #tpu.memory_space<vmem>>, vector<4x1xf32>
    %121 = vector.broadcast %120 : vector<4x1xf32> to vector<4x288xf32>
    %122 = arith.addf %119, %121 : vector<4x288xf32>
    %cst_53 = arith.constant 0.000000e+00 : f32
    %123 = vector.broadcast %cst_53 : f32 to vector<4x288xf32>
    %124 = arith.cmpf oge, %122, %123 : vector<4x288xf32>
    %cst_54 = arith.constant 1.000000e+00 : f32
    %125 = vector.broadcast %cst_54 : f32 to vector<4x288xf32>
    %126 = arith.mulf %125, %122 : vector<4x288xf32>
    %127 = arith.select %124, %122, %126 : vector<4x288xi1>, vector<4x288xf32>
    %c0_55 = arith.constant 0 : index
    %c0_56 = arith.constant 0 : index
    %128 = vector.load %arg5[%c0_55, %c0_56] : memref<4x4xf32, #tpu.memory_space<vmem>>, vector<4x4xf32>
    %cst_57 = arith.constant dense<0.000000e+00> : vector<4x288xf32>
    %129 = tpu.matmul %128, %127, %cst_57 {dimension_numbers = #tpu.dot_dimension_numbers<[1], [0], [0], [1], [0, 0, 1, 1], [], []>} : vector<4x4xf32>, vector<4x288xf32>, vector<4x288xf32> -> vector<4x288xf32>
    %c0_58 = arith.constant 0 : index
    %c0_59 = arith.constant 0 : index
    %130 = vector.load %arg6[%c0_58, %c0_59] : memref<4x1xf32, #tpu.memory_space<vmem>>, vector<4x1xf32>
    %131 = vector.broadcast %130 : vector<4x1xf32> to vector<4x288xf32>
    %132 = arith.addf %129, %131 : vector<4x288xf32>
    %cst_60 = arith.constant 0.000000e+00 : f32
    %133 = vector.broadcast %cst_60 : f32 to vector<4x288xf32>
    %134 = arith.cmpf oge, %132, %133 : vector<4x288xf32>
    %cst_61 = arith.constant 1.000000e+00 : f32
    %135 = vector.broadcast %cst_61 : f32 to vector<4x288xf32>
    %136 = arith.mulf %135, %132 : vector<4x288xf32>
    %137 = arith.select %134, %132, %136 : vector<4x288xi1>, vector<4x288xf32>
    %cst_62 = arith.constant 1.000000e+00 : f32
    %138 = vector.broadcast %cst_62 : f32 to vector<4x288xf32>
    %139 = arith.mulf %137, %138 : vector<4x288xf32>
    %140 = vector.extract_strided_slice %139 {offsets = [0, 0], sizes = [4, 256], strides = [1, 1]} : vector<4x288xf32> to vector<4x256xf32>
    %c0_63 = arith.constant 0 : index
    %c0_64 = arith.constant 0 : index
    %c0_65 = arith.constant 0 : index
    %141 = vector.load %arg7[%c0_63, %c0_64, %c0_65] : memref<1x4x256xf32, #tpu.memory_space<vmem>>, vector<1x4x256xf32>
    %142 = vector.shape_cast %141 : vector<1x4x256xf32> to vector<4x256xf32>
    %143 = vector.shape_cast %140 : vector<4x256xf32> to vector<1x4x256xf32>
    tpu.vector_store %arg7[%c0_63, %c0_64, %c0_65], %143 {strides = array<i32>} : memref<1x4x256xf32, #tpu.memory_space<vmem>>, vector<1x4x256xf32>,
    return
  }
  func.func @transform_0(%arg0: i32, %arg1: i32) -> (i32, i32, i32, i32) {
    %c0_i32 = arith.constant 0 : i32
    %c0_i32_0 = arith.constant 0 : i32
    %c0_i32_1 = arith.constant 0 : i32
    return %arg0, %arg1, %c0_i32, %c0_i32_0 : i32, i32, i32, i32
  }
  func.func @transform_1(%arg0: i32, %arg1: i32) -> (i32, i32, i32) {
    %c0_i32 = arith.constant 0 : i32
    %c0_i32_0 = arith.constant 0 : i32
    %c0_i32_1 = arith.constant 0 : i32
    %c0_i32_2 = arith.constant 0 : i32
    return %c0_i32, %c0_i32_0, %c0_i32_1 : i32, i32, i32
  }
  func.func @transform_2(%arg0: i32, %arg1: i32) -> (i32, i32) {
    %c0_i32 = arith.constant 0 : i32
    %c0_i32_0 = arith.constant 0 : i32
    %c0_i32_1 = arith.constant 0 : i32
    return %c0_i32, %c0_i32_0 : i32, i32
  }
  func.func @transform_3(%arg0: i32, %arg1: i32) -> (i32, i32) {
    %c0_i32 = arith.constant 0 : i32
    %c0_i32_0 = arith.constant 0 : i32
    %c0_i32_1 = arith.constant 0 : i32
    return %c0_i32, %c0_i32_0 : i32, i32
  }
  func.func @transform_4(%arg0: i32, %arg1: i32) -> (i32, i32) {
    %c0_i32 = arith.constant 0 : i32
    %c0_i32_0 = arith.constant 0 : i32
    %c0_i32_1 = arith.constant 0 : i32
    return %c0_i32, %c0_i32_0 : i32, i32
  }
  func.func @transform_5(%arg0: i32, %arg1: i32) -> (i32, i32, i32) {
    %c0_i32 = arith.constant 0 : i32
    %c0_i32_0 = arith.constant 0 : i32
    return %arg0, %c0_i32, %arg1 : i32, i32, i32
  }
}

</mosaic_0001>

<bundles_post_ra>
// kernel: tpu_custom_call.1
= control target key start
LH: loop header
LB: loop body
LE: loop exit
PB: predicated region body
PF: predicated region fallthrough
CT: control target
= control target key end

     0   :  { %10 = vsyncpa [#allocation3], 0  ;;  %s1883_s0 = inlined_call_operand.vmem [shape: f32[2,1,4,288], index: 0, kind: input, shape index: {}]   ;;  %s1884_s1 = inlined_call_operand.vmem [shape: f32[9,4,4], index: 1, kind: input, shape index: {}]   ;;  %s1885_s2 = inlined_call_operand.vmem [shape: f32[4,1], index: 2, kind: input, shape index: {}]   ;;  %s1886_s3 = inlined_call_operand.vmem [shape: f32[4,4], index: 3, kind: input, shape index: {}]   ;;  %s1887_s4 = inlined_call_operand.vmem [shape: f32[4,1], index: 4, kind: input, shape index: {}]   ;;  %s1888_s5 = inlined_call_operand.hbm [shape: f32[2,4,256], index: 5, kind: output, shape index: {}]  }
   0x1   :  { %12 = vsyncpa [#allocation3 + $0x1], 0  ;;  %s1608_s18 = smov 0   ;;  %s1610_s19 = smov 0  }
   0x2   :  { %s1612_s20 = smov 0   ;;  %s1614_s21 = smov 0  }
   0x3   :  { %s1616_s22 = smov 0   ;;  %s1618_s23 = smov 0  }
   0x4 LB: > { %s1351_s24 = sadd.s32 4294967295, %s1565_s23   ;;  %s1352_s25 = sadd.s32 4294967294, %s1565_s23   ;;  %s1565_s23 = sphi %s1618_s23, %s18_s23   ;;  %s1561_s22 = sphi %s1616_s22, %s1903_s22   ;;  %s1557_s21 = sphi %s1614_s21, %s1902_s21   ;;  %s1553_s20 = sphi %s1612_s20, %s1901_s20   ;;  %s1549_s19 = sphi %s1610_s19, %s1900_s19   ;;  %s1545_s18 = sphi %s1608_s18, %s1899_s18  }
   0x5   : > { %s30_s26 = sadd.s32 1, %s1561_s22  ;;  %s151_s27 = sadd.s32 1, %s1553_s20 }
   0x6   : > { %p32_p0 = scmp.ge.s32.totalorder %s30_s26, 2  ;;  %p161_p1 = scmp.ne.s32.totalorder %s1553_s20, %s1549_s19 }
   0x7   : > { %p162_p2 = scmp.eq.s32.totalorder %s1351_s24, 1  ;;  %p167_p3 = scmp.ne.s32.totalorder %s1549_s19, %s1545_s18 }
   0x8   : > { %s1905_s26 = smov (%p32_p0, %s30_s26), 0  ;;  %p168_p5 = scmp.eq.s32.totalorder %s1352_s25, 1 }
   0x9   : > { %p1648_p4 = por %p162_p2, %p161_p1  ;;  %s146_s29 = ssub.s32 %s1561_s22, %s1905_s26 }
   0xa   : > { %p1355_p6 = scmp.ge.s32.totalorder %s1565_s23, 1  ;;  %p149_p7 = scmp.eq.s32.totalorder %s146_s29, 0 }
   0xb   : > { %p1655_p8 = por %p168_p5, %p167_p3  ;;  %p210_p9 = scmp.lt.s32.totalorder %s1565_s23, 3 }
   0xc   : > { %s1661_s6 = scalar_select %p149_p7, %s1553_s20, %s151_s27  }
   0xd   : > { %p211_p10 = pnand %p1355_p6, %p210_p9 }
   0xe   : > { %p242_p11 = scmp.lt.s32.totalorder (!%p211_p10), %s1557_s21, 1  ;;  %s1567_s12 = smov (!%p211_p10), 32   ;;  %vm284_vm0 = vcmask (!%p211_p10), 1047808   ;;  %v1572_v5 = vmov (!%p211_p10), 0.0   ;;  %v254_v10 = vlaneseq (!%p211_p10)  ;;  %vm691_vm1 = vcmask (!%p211_p10), 916480  }
   0xf   : > { %214 = sbr.rel (%p211_p10) target bundleno = 847 (0x34f), region = 40  ;;  %s1568_s13 = smov (!%p211_p10), 127   ;;  %765 = vmatprep.mubr.f32.mxu0 (!%p211_p10), %v1572_v5  ;;  %423 = vmatprep.mubr.f32.mxu1 (!%p211_p10), %v1572_v5  ;;  %vm352_vm2 = vcmask (!%p211_p10), 1043456   ;;  %vm348_vm3 = vcmask (!%p211_p10), 31744   ;;  %v1373_v19 = vld [vmem:[%s1884_s1 + $0x10] sm:$0xf] (!%p211_p10) }
  0x10   : > { %s1569_s14 = smov (!%p211_p10), 111   ;;  %s1570_s15 = smov (!%p211_p10), 112   ;;  %v255_v13 = vand.u32 (!%p211_p10), 127, %v254_v10  ;;  %v1576_v25 = vmov (!%p211_p10), 0   ;;  %vm339_vm4 = vcmask (!%p211_p10), 1039360   ;;  %vm780_vm7 = vcmask (!%p211_p10), 908288  }
  0x11   : > { %s1571_s16 = smov (!%p211_p10), 97   ;;  %s1573_s17 = smov (!%p211_p10), 113   ;;  %1484 = vset.pattern.permute.xlu0 (!%p211_p10), %v1576_v25  ;;  %1485 = vset.pattern.permute.xlu1 (!%p211_p10), %v1576_v25  ;;  %v1359_v35 = vld [vmem:[%s1884_s1 + $0x8] sm:$0xf] (!%p211_p10)  ;;  %v1155_v36 = vld [vmem:[%s1885_s2] sm:$0xf] (!%p211_p10) }
  0x12   : > { %s1574_s24 = smov (!%p211_p10), 96   ;;  %s1575_s25 = smov (!%p211_p10), 95   ;;  %v256_v17 = vadd.s32 (!%p211_p10), 128, %v255_v13  ;;  %v261_v23 = vand.u32 (!%p211_p10), 15, %v255_v13  ;;  %vm313_vm8 = vcmask (!%p211_p10), 793600   ;;  %vm516_vm11 = vcmask (!%p211_p10), 924672  }
  0x13   : > { %v1377_v41 = vld [vmem:[%s1884_s1 + $0x14] sm:$0xf] (!%p211_p10)  ;;  %v1381_v50 = vld [vmem:[%s1884_s1 + $0x18] sm:$0xf] (!%p211_p10)  ;;  %v320_v58 = vld [vmem:[%s1884_s1] sm:$0xf] (!%p211_p10) }
  0x14   : > { %v268_v21 = vand.u32 (!%p211_p10), 15, %v256_v17  ;;  %vm1720_vm6 = vcmp.lt.s32.totalorder (!%p211_p10), %v261_v23, 15  ;;  %vm1753_vm10 = vcmp.ge.s32.totalorder (!%p211_p10), %v261_v23, 1  ;;  %vm973_vm12 = vcmask (!%p211_p10), 785408   ;;  %v1385_v10 = vld [vmem:[%s1884_s1 + $0x1c] sm:$0xf] (!%p211_p10) }
  0x15   : > { %vm1062_vm13 = vcmask (!%p211_p10), 777216  }
  0x16   : > { %s243_s7 = scalar_select %p242_p11, %s1557_s21, 1  ;;  %vm1716_vm5 = vcmp.lt.s32.totalorder %v268_v21, 15  ;;  %vm1748_vm9 = vcmp.ge.s32.totalorder %v268_v21, 1 }
  0x18   : > { %s1418_s8 = smul.u32 12, %s243_s7 }
  0x1a   : > { %s250_s11 = scalar_lea.vmem %s1883_s0, %s1418_s8 }
  0x1b   : > { %v1668_v0 = vld [vmem:[%s250_s11] sm:$0xff]  ;;  %v253_v2 = vld [vmem:[%s250_s11 + $0x8] sm:$0xf] }
  0x1c   : > { %285 = vrot.lane.b32.xlu0 %v1668_v0, %s1567_s12  ;;  %v1673_v1 = vcombine.high %v1668_v0, %v1668_v0 }
  0x20   : > { %288 = vrot.lane.b32.xlu0 %v1673_v1, %s1567_s12 }
  0x24   : > { %335 = vrot.lane.b32.xlu0 %v1673_v1, %s1568_s13 }
  0x28   : > { %776 = vrot.lane.b32.xlu0 %v1673_v1, %s1569_s14 }
  0x8e   : > { %v286_v3 = vpop.permute.xlu0 %285 }
  0x8f   : > { %v1679_v4 = vsel %vm284_vm0, %v286_v3, %v253_v2 }
  0x90   : > { %290 = vrot.lane.b32.xlu1 %v1679_v4, %s1567_s12  ;;  %689 = vrot.lane.b32.xlu0 %v1679_v4, %s1570_s15 }
  0x92   : > { %v289_v6 = vpop.permute.xlu0 %288 }
  0x93   : > { %v292_v7 = vsel %vm284_vm0, %v289_v6, %v286_v3 }
  0x94   : > { %687 = vrot.lane.b32.xlu1 %v1673_v1, %s1570_s15  ;;  %333 = vrot.lane.b32.xlu0 %v1668_v0, %s1568_s13 }
  0x96   : > { %v336_v8 = vpop.permute.xlu0 %335 }
  0x98   : > { %685 = vrot.lane.b32.xlu1 %v1668_v0, %s1570_s15  ;;  %871 = vrot.lane.b32.xlu0 %v1668_v0, %s1571_s16 }
  0x9a   : > { %v777_v9 = vpop.permute.xlu0 %776 }
  0x9c   : > { %774 = vrot.lane.b32.xlu1 %v1668_v0, %s1569_s14  ;;  %307 = vrot.lane.b32.xlu0 %v1679_v4, %s1571_s16 }
  0xa0   : > { %337 = vrot.lane.b32.xlu1 %v1679_v4, %s1568_s13 }
  0xa4   : > { %778 = vrot.lane.b32.xlu1 %v1679_v4, %s1569_s14  ;;  %s239_s14 = sand.u32 1, %s1549_s19  }
  0xa5   : > { %s1356_s15 = sshll.u32 %s239_s14, 3  ;;  %s1256_s7 = scalar_lea.sflag [#allocation3], %s239_s14 }
  0xa8   : > { %873 = vrot.lane.b32.xlu1 %v1673_v1, %s1571_s16 }
  0xac   : > { %309 = vrot.lane.b32.xlu1 %v292_v7, %s1571_s16 }
  0xb0   : > { %512 = vrot.lane.b32.xlu1 %v1673_v1, %s1573_s17 }
  0xb4   : > { %510 = vrot.lane.b32.xlu1 %v1668_v0, %s1573_s17 }
  0xb8   : > { %971 = vrot.lane.b32.xlu1 %v1679_v4, %s1574_s24 }
  0xbc   : > { %1058 = vrot.lane.b32.xlu1 %v1673_v1, %s1575_s25 }
  0xc0   : > { %1056 = vrot.lane.b32.xlu1 %v1668_v0, %s1575_s25 }
 0x102   : > { %v291_v11 = vpop.permute.xlu1 %290  ;;  %v690_v14 = vpop.permute.xlu0 %689 }
 0x103   : > { %v293_v12 = vsel %vm284_vm0, %v291_v11, %v289_v6 }
 0x104   : > { %311 = vrot.lane.b32.xlu0 %v293_v12, %s1571_s16  ;;  %s1401_s16 = sshll.u32 %s1557_s21, 7  ;;  %s1577_s21 = smov [#allocation2]  }
 0x105   : > { %s1836_s29 = scalar_lea.hbm %s1888_s5, %s1401_s16  ;;  %s1491_s9 = sshll.u32 %s1577_s21, 4  ;;  %s1492_s9 = int_to_ptr.vmem [resolvable:$false] %s1491_s9 }
 0x106   : > { %v688_v15 = vpop.permute.xlu1 %687  ;;  %v334_v22 = vpop.permute.xlu0 %333  ;;  %s1493_s10 = scalar_lea.vmem %s1492_s9, 256 }
 0x107   : > { %v693_v16 = vsel %vm691_vm1, %v688_v15, %v690_v14  ;;  %v340_v26 = vsel %vm339_vm4, %v334_v22, %v336_v8 }
 0x108   : > { %514 = vrot.lane.b32.xlu0 %v1679_v4, %s1573_s17  ;;  %1374 = vmatprep.subr.msk.mxu0 %vm352_vm2, %v693_v16  ;;  %v344_v31 = vsel %vm1720_vm6, %v340_v26, 0.0  ;;  %v1358_v16 = vld [vmem:[%s1884_s1 + $0x4] sm:$0xf]  ;;  %s241_s17 = scalar_lea.vmem [#allocation2], %s1356_s15 }
 0x10a   : > { %v686_v18 = vpop.permute.xlu1 %685  ;;  %v872_v32 = vpop.permute.xlu0 %871 }
 0x10b   : > { %v692_v20 = vsel %vm691_vm1, %v686_v18, %v688_v15  ;;  %v1164_v18 = vld [vmem:[%s1887_s4] sm:$0xf] }
 0x10c   : > { %969 = vrot.lane.b32.xlu0 %v1673_v1, %s1574_s24  ;;  %1375 = vmatpush1.msk.msra.mxu0 %vm352_vm2, %v692_v20 }
 0x10d   : > { %1376 = vmatmul.mubr.msk.f32.vlgmr.msra.gmra.mrb[0].mxu0 %vm348_vm3, %v1373_v19  ;;  %1167 = vperm.xlu1 %1485, %v1164_v18  }
 0x10e   : > { %v775_v24 = vpop.permute.xlu1 %774  ;;  %862 = vmatprep.mubr.f32.mxu0 %v1572_v5  ;;  %v308_v43 = vpop.permute.xlu0 %307 }
 0x10f   : > { %v781_v33 = vsel %vm780_vm7, %v775_v24, %v777_v9 }
 0x110   : > { %967 = vrot.lane.b32.xlu0 %v1668_v0, %s1574_s24  ;;  %v785_v38 = vsel %vm1720_vm6, %v781_v33, 0.0  ;;  %s1272_s24 = sshll.u32 %s241_s17, 4  ;;  %s1838_s24 = int_to_ptr.vmem [resolvable:$true] %s1272_s24 }
 0x111   : > { %s1487_s8 = scalar_lea.vmem %s1838_s24, 128  ;;  %p1494_p1 = scmp.lt.s32.totalorder %s1838_s24, %s1492_s9 }
 0x112   : > { %v338_v29 = vpop.permute.xlu1 %337  ;;  %p1488_p12 = scmp.ne.s32.totalorder %s1838_s24, %s1487_s8  ;;  %p1495_p2 = scmp.lt.s32.totalorder %s1493_s10, %s1487_s8 }
 0x113   : > { %v341_v30 = vsel %vm339_vm4, %v336_v8, %v338_v29  ;;  %v1366_v8 = vld [vmem:[%s1884_s1 + $0xc] sm:$0xf] }
 0x114   : > { %1060 = vrot.lane.b32.xlu0 %v1679_v4, %s1575_s25  ;;  %v345_v34 = vsel %vm1716_vm5, %v341_v30, 0.0  ;;  %p1489_p13 = pnand %p1488_p12, %p1648_p4  ;;  %p1496_p3 = por %p1495_p2, %p1494_p1 }
 0x115   : > { %1360 = vmatprep.subr.msk.mxu1 %vm352_vm2, %v345_v34 }
 0x116   : > { %v779_v37 = vpop.permute.xlu1 %778  ;;  %1361 = vmatpush1.msk.msra.mxu1 %vm352_vm2, %v344_v31  ;;  %p1490_p0 = pneg %p1489_p13 }
 0x117   : > { %v782_v39 = vsel %vm780_vm7, %v777_v9, %v779_v37  ;;  %1362 = vmatmul.mubr.msk.f32.vlgmr.msra.gmra.mrb[0].mxu1 %vm348_vm3, %v1359_v35 }
 0x118   : > { %v786_v40 = vsel %vm1716_vm5, %v782_v39, 0.0  ;;  %503 = vmatprep.mubr.f32.mxu1 %v1572_v5  ;;  %1158 = vperm.xlu0 %1484, %v1155_v36   ;;  %p1497_p5 = pnand %p1496_p3, %p1490_p0 }
 0x119   : > { %1378 = vmatprep.subr.msk.mxu0 %vm352_vm2, %v786_v40 }
 0x11a   : > { %v874_v44 = vpop.permute.xlu1 %873  ;;  %1379 = vmatpush1.msk.msra.mxu0 %vm352_vm2, %v785_v38 }
 0x11b   : > { %v875_v46 = vsel %vm313_vm8, %v872_v32, %v874_v44  ;;  %v876_v47 = vsel %vm313_vm8, %v874_v44, %v308_v43  ;;  %1380 = vmatmul.mubr.msk.f32.vlgmr.msra.gmra.mrb[0].mxu0 %vm348_vm3, %v1377_v41 }
 0x11c   : > { %v879_v48 = vsel %vm1753_vm10, %v875_v46, 0.0  ;;  %v880_v49 = vsel %vm1748_vm9, %v876_v47, 0.0  ;;  %956 = vmatprep.mubr.f32.mxu0 %v1572_v5 }
 0x11d   : > { %1382 = vmatprep.subr.msk.mxu0 %vm352_vm2, %v880_v49 }
 0x11e   : > { %1383 = vmatpush1.msk.msra.mxu0 %vm352_vm2, %v879_v48  ;;  %v310_v51 = vpop.permute.xlu1 %309 }
 0x11f   : > { %v314_v54 = vsel %vm313_vm8, %v308_v43, %v310_v51 }
 0x120   : > { %v318_v59 = vsel %vm1753_vm10, %v314_v54, 0.0 }
 0x122   : > { %v513_v52 = vpop.permute.xlu1 %512 }
 0x123   : > { %1384 = vmatmul.mubr.msk.f32.vlgmr.msra.gmra.mrb[0].mxu0 %vm348_vm3, %v1381_v50 }
 0x124   : > { %1047 = vmatprep.mubr.f32.mxu0 %v1572_v5 }
 0x126   : > { %v511_v53 = vpop.permute.xlu1 %510 }
 0x127   : > { %v517_v61 = vsel %vm516_vm11, %v511_v53, %v513_v52 }
 0x128   : > { %v521_v3 = vsel %vm1753_vm10, %v517_v61, 0.0 }
 0x12a   : > { %v972_v60 = vpop.permute.xlu1 %971 }
 0x12e   : > { %v1059_v4 = vpop.permute.xlu1 %1058 }
 0x132   : > { %v1057_v12 = vpop.permute.xlu1 %1056 }
 0x176   : > { %v312_v55 = vpop.permute.xlu0 %311 }
 0x177   : > { %v315_v56 = vsel %vm313_vm8, %v310_v51, %v312_v55 }
 0x178   : > { %v319_v57 = vsel %vm1748_vm9, %v315_v56, 0.0 }
 0x179   : > { %1363 = vmatprep.subr.msk.mxu1 %vm352_vm2, %v319_v57 }
 0x17a   : > { %1364 = vmatpush1.msk.msra.mxu1 %vm352_vm2, %v318_v59  ;;  %v515_v62 = vpop.permute.xlu0 %514 }
 0x17b   : > { %v518_v63 = vsel %vm516_vm11, %v513_v52, %v515_v62  ;;  %1365 = vmatmul.mubr.msk.f32.vlgmr.msra.gmra.mrb[0].mxu1 %vm348_vm3, %v320_v58 }
 0x17c   : > { %v522_v2 = vsel %vm1748_vm9, %v518_v63, 0.0  ;;  %598 = vmatprep.mubr.f32.mxu1 %v1572_v5 }
 0x17d   : > { %1367 = vmatprep.subr.msk.mxu1 %vm352_vm2, %v522_v2 }
 0x17e   : > { %1368 = vmatpush1.msk.msra.mxu1 %vm352_vm2, %v521_v3  ;;  %v970_v6 = vpop.permute.xlu0 %969 }
 0x17f   : > { %v975_v7 = vsel %vm973_vm12, %v970_v6, %v972_v60  ;;  %1370 = vmatprep.subr.msk.mxu1 %vm352_vm2, %v1673_v1  ;;  %v1063_v1 = vsel %vm1062_vm13, %v1057_v12, %v1059_v4 }
 0x180   : > { %1386 = vmatprep.subr.msk.mxu0 %vm352_vm2, %v975_v7  ;;  %v1067_v17 = vsel %vm1720_vm6, %v1063_v1, 0.0 }
 0x182   : > { %v968_v9 = vpop.permute.xlu0 %967 }
 0x183   : > { %v974_v11 = vsel %vm973_vm12, %v968_v9, %v970_v6  ;;  %1369 = vmatmul.mubr.msk.f32.vlgmr.msra.gmra.mrb[0].mxu1 %vm348_vm3, %v1366_v8 }
 0x184   : > { %1387 = vmatpush1.msk.msra.mxu0 %vm352_vm2, %v974_v11  ;;  %1371 = vmatpush1.msk.msra.mxu1 %vm352_vm2, %v1668_v0  ;;  %v1389_v0 = vld [vmem:[%s1884_s1 + $0x20] sm:$0xf] }
 0x185   : > { %1388 = vmatmul.mubr.msk.f32.vlgmr.msra.gmra.mrb[0].mxu0 %vm348_vm3, %v1385_v10  ;;  %676 = vmatprep.mubr.f32.mxu1 %v1572_v5 }
 0x186   : > { %v1061_v13 = vpop.permute.xlu0 %1060  ;;  %1144 = vmatprep.mubr.f32.mxu0 %v1572_v5 }
 0x187   : > { %v1064_v14 = vsel %vm1062_vm13, %v1059_v4, %v1061_v13 }
 0x188   : > { %v1068_v15 = vsel %vm1716_vm5, %v1064_v14, 0.0 }
 0x189   : > { %1390 = vmatprep.subr.msk.mxu0 %vm352_vm2, %v1068_v15 }
 0x18a   : > { %1391 = vmatpush1.msk.msra.mxu0 %vm352_vm2, %v1067_v17 }
 0x18b   : > { %1372 = vmatmul.mubr.msk.f32.vlgmr.msra.gmra.mrb[0].mxu1 %vm348_vm3, %v1358_v16 }
 0x18c   : > { %1243 = vmatprep.mubr.f32.mxu1 %v1572_v5  ;;  %v1163_v5 = vld [vmem:[%s1886_s3] sm:$0xf]  ;;  %v1168_v28 = vpop.permute.xlu1 %1167 }
 0x18d   : > { %1392 = vmatmul.mubr.msk.f32.vlgmr.msra.gmra.mrb[0].mxu0 %vm348_vm3, %v1389_v0 }
 0x197   : > { %v1159_v24 = vpop.permute.xlu0 %1158 }
 0x25e   : > { %v678_v19 = vpop.f32.mrb[0].mxu1 }
 0x25f   : > { %v680_v20 = vpop.f32.mrb[1].mxu1 }
 0x260   : > { %v1146_v21 = vpop.f32.mrb[0].mxu0 }
 0x261   : > { %v1402_v22 = vadd.f32 %v1146_v21, %v678_v19  ;;  %v1148_v23 = vpop.f32.mrb[1].mxu0 }
 0x262   : > { %v1403_v25 = vadd.f32 %v1148_v23, %v680_v20 }
 0x263   : > { %v1161_v27 = vadd.f32 %v1402_v22, %v1159_v24 }
 0x264   : > { %v1162_v26 = vadd.f32 %v1403_v25, %v1159_v24 }
 0x266   : > { %1393 = vmatprep.subr.msk.mxu1 %vm352_vm2, %v1162_v26 }
 0x267   : > { %1394 = vmatpush1.msk.msra.mxu1 %vm352_vm2, %v1161_v27 }
 0x268   : > { %1395 = vmatmul.mubr.msk.f32.vlgmr.msra.gmra.mrb[2].mxu1 %vm348_vm3, %v1163_v5 }
 0x33b   : > { %v1245_v29 = vpop.f32.mrb[2].mxu1 }
 0x33c   : > { %v1246_v30 = vadd.f32 %v1245_v29, %v1168_v28  ;;  %v1247_v31 = vpop.f32.mrb[3].mxu1 }
 0x33d   : > { %v1248_v32 = vadd.f32 %v1247_v31, %v1168_v28 }
 0x33f   : > { %v1252_v33 = vcombine.low %v1246_v30, %v1248_v32 }
 0x341   : > { %1254 = vst [vmem:[%s241_s17] sm:$0xff] %v1252_v33 }
 0x342   : > { %1500 = shalt.err (!%p1497_p5)
}
 0x343   : > { %s1501_s11 = scalar_lea.hbm %s1836_s29, 128  ;;  %s1505_s14 = scalar_lea.hbm %s1888_s5, 256 }
 0x344   : > { %p1502_p6 = scmp.ne.s32.totalorder %s1836_s29, %s1501_s11  ;;  %p1506_p10 = scmp.lt.u32.totalorder %s1836_s29, %s1888_s5 }
 0x345   : > { %p1507_p11 = scmp.lt.u32.totalorder %s1505_s14, %s1501_s11  ;;  %p1509_p13 = scmp.lt.u32.totalorder %s1501_s11, %s1836_s29 }
 0x346   : > { %p1503_p7 = pnand %p1502_p6, %p1648_p4 }
 0x347   : > { %p1508_p12 = por %p1507_p11, %p1506_p10 }
 0x348   : > { %p1504_p9 = pneg %p1503_p7 }
 0x349   : > { %p1510_p0 = por %p1509_p13, %p1508_p12 }
 0x34b   : > { %p1511_p1 = pnand %p1510_p0, %p1504_p9 }
 0x34d   : > { %1514 = shalt.err (!%p1511_p1)
}
 0x34e   : > { %1419 = dma.vmem_to_hbm [thread:$0]  (%p1648_p4), %s1838_s24, 128, %s1836_s29, %s1256_s7  }
 0x34f PF: > { %p1425_p2 = scmp.ge.s32.totalorder %s1565_s23, 2  ;;  %s1284_s17 = sand.u32 1, %s1545_s18  }
 0x350   : > { %s1285_s25 = scalar_lea.sflag [#allocation3], %s1284_s17 }
 0x351   : > { %p1422_p3 = pnand %p1425_p2, %p1655_p8 }
 0x353   : > { %1540 = dma.done.wait (!%p1422_p3), %s1285_s25, 128  }
 0x354   : > { %1542 = vsyncadd (!%p1422_p3), %s1285_s25, 4294967168  ;;  %s18_s23 = sadd.s32 1, %s1565_s23   ;;  %s1899_s18 = smov %s1549_s19 }
 0x355   : > { %p15_p5 = scmp.ge.s32.totalorder %s18_s23, 4   ;;  %s1900_s19 = smov %s1553_s20 }
 0x356   : > { %s1901_s20 = smov %s1661_s6  ;;  %s1902_s21 = smov %s1561_s22 }
 0x357   : > { %s1903_s22 = smov %s1905_s26  ;;  %17 = sbr.rel (!%p15_p5) target bundleno = 4 (0x4), region = 83 }
 0x35e   :  { %1290 = vsyncpa [#allocation3], 1 }
 0x35f   :  { %1292 = vsyncpa [#allocation3 + $0x1], 1 }

</bundles_post_ra>
